<compile_context>
chip_gen: v6e
topology: v6e:2x2x1
jax: 0.10.0
libtpu: 0.0.40
codegen_flags: <defaults>
</compile_context>

<pallas_src>
import jax
import jax.numpy as jnp
from jax.experimental import pallas as pl
from jax.experimental.pallas import tpu as pltpu

LEAKY_SLOPE = 0.2   # the module uses nn.LeakyReLU(0.2)
BN_EPS = 1e-5


def _pad_to(c, m):
    return -(-c // m) * m


# ---------------------------------------------------------------------------
# Pallas kernel
# ---------------------------------------------------------------------------
def _make_kernel(block_batch, L, L_p, c1p, c2p, c3p, c3):
    M = block_batch * L_p   # flattened rows per grid step (batch_block * length)

    def kernel(x_ref, w1_ref, w2_ref, w3_ref, bias_ref, o_ref):
        # Position of each flattened row within its own (padded) sequence.
        pos = jax.lax.broadcasted_iota(jnp.int32, (M, 1), 0)
        if (L_p & (L_p - 1)) == 0:
            pos = pos & (L_p - 1)
        else:
            pos = pos % L_p          # once per grid step; minor VPU cost
        first_row = pos == 0         # l == 0       -> no l-1 tap
        last_row = pos == L_p - 1    # l == L_p - 1 -> no l+1 tap

        def conv3(h, w_ref, bias, cp):
            """Conv1d(k=3, padding=1) + bias on a flattened (M, Cin_pad) tile.

            w_ref holds the three taps fused along the lane axis, each padded
            to `cp` (a 128 multiple), so a single MXU dot computes all taps
            and the tap slices below are lane-aligned.
            """
            hb = h if h.dtype == jnp.bfloat16 else h.astype(jnp.bfloat16)
            z = jnp.dot(hb, w_ref[...], preferred_element_type=jnp.float32)
            z0 = z[:, 0 * cp:1 * cp]          # tap applied to x[l-1]
            z1 = z[:, 1 * cp:2 * cp]          # tap applied to x[l]
            z2 = z[:, 2 * cp:3 * cp]          # tap applied to x[l+1]
            # y[m] = z0[m-1] + z1[m] + z2[m+1]; sublane rolls on the XLU,
            # boundary masks kill the wrapped / cross-sequence rows (Conv1d
            # zero padding).
            z_m1 = pltpu.roll(z0, shift=1, axis=0)        # z0[m-1]
            z_p1 = pltpu.roll(z2, shift=M - 1, axis=0)    # z2[m+1]  (== -1)
            return (jnp.where(first_row, 0.0, z_m1) + z1
                    + jnp.where(last_row, 0.0, z_p1) + bias)

        def lrelu(h):
            return jnp.where(h > 0, h, LEAKY_SLOPE * h)

        def zero_pad_rows(h):
            # Only needed if L was padded: padded rows must stay exactly zero
            # so the next conv sees zero padding at the sequence tail.
            if L_p == L:
                return h
            return jnp.where(pos < L, h, 0.0)

        x = x_ref[...]                        # (M, C0_pad) bfloat16

        b1 = bias_ref[0:1, 0:c1p]             # conv1 bias (padded with zeros)
        t2 = bias_ref[1:2, 0:c2p]             # conv2 bias + BN2 folded
        t3 = bias_ref[2:3, 0:c3p]             # conv3 bias + BN3 folded

        # block 1: conv -> LeakyReLU                 (normalize=False)
        h = zero_pad_rows(lrelu(conv3(x, w1_ref, b1, c1p)))
        # block 2: conv (BN2 folded into weights/bias) -> LeakyReLU
        h = zero_pad_rows(lrelu(conv3(h, w2_ref, t2, c2p)))
        # final:   conv (BN3 folded), no activation
        h = conv3(h, w3_ref, t3, c3p)         # (M, c3p)

        # Lane-dense single store: o[0, c, m] = h[m, c] with M on the lane
        # axis.  The channel-major per-batch rearrangement happens in the
        # wrapper (tiny XLA transpose).
        o_ref[0] = jnp.transpose(h[:, :c3])

    return kernel


# ---------------------------------------------------------------------------
# Wrapper
# ---------------------------------------------------------------------------
def feature_extractor(x, params, *, block_batch=None, vmem_limit_mb=48):
    """x: (N, L, C_in) float32 -> (N, C_out * L) float32 (PyTorch semantics)."""
    w1f, w2f, w3f, bias_pack, c3 = params
    N, L, C0 = x.shape
    c0p = w1f.shape[0]
    c1p, c2p, c3p = w1f.shape[1] // 3, w2f.shape[1] // 3, w3f.shape[1] // 3

    # Pad L to a 16 multiple so bf16 row blocks are sublane-tile aligned.
    L_p = _pad_to(L, 16)

    if block_batch is None:
        # Target ~1024 flattened rows per step, but keep >=2 grid steps when
        # the batch allows it so megacore ("parallel") can shard the grid.
        block_batch = max(1, min(N, 1024 // L_p))
        if N > 1 and block_batch == N:
            block_batch = -(-N // 2)
    N_p = _pad_to(N, block_batch)
    M = block_batch * L_p
    G = N_p // block_batch

    x = x.astype(jnp.bfloat16)                  # halve input DMA / VMEM
    if (N_p, L_p, c0p) != (N, L, C0):
        x = jnp.pad(x, ((0, N_p - N), (0, L_p - L), (0, c0p - C0)))
    x_flat = x.reshape(N_p * L_p, c0p)          # free: row-major collapse

    def full_spec(a):
        nd = a.ndim
        return pl.BlockSpec(a.shape, lambda g, _nd=nd: (0,) * _nd)

    out = pl.pallas_call(
        _make_kernel(block_batch, L, L_p, c1p, c2p, c3p, c3),
        out_shape=jax.ShapeDtypeStruct((G, c3, M), jnp.float32),
        grid_spec=pltpu.PrefetchScalarGridSpec(
            num_scalar_prefetch=0,
            grid=(G,),
            in_specs=[
                pl.BlockSpec((M, c0p), lambda g: (g, 0)),
                full_spec(w1f), full_spec(w2f), full_spec(w3f),
                full_spec(bias_pack),
            ],
            out_specs=pl.BlockSpec((1, c3, M), lambda g: (g, 0, 0)),
        ),
        compiler_params=pltpu.CompilerParams(
            dimension_semantics=("parallel",),
            vmem_limit_bytes=vmem_limit_mb * 1024 * 1024,
        ),
    )(x_flat, w1f, w2f, w3f, bias_pack)

    # (G, C3, block_batch*L_p) -> (N, C3*L); tiny XLA transpose in the wrapper
    # keeps the kernel's store lane-dense.
    out = out.reshape(G, c3, block_batch, L_p).transpose(0, 2, 1, 3)
    out = out.reshape(N_p, c3, L_p)[:N, :, :L]
    return out.reshape(N, c3 * L)


# ---------------------------------------------------------------------------
# Parameter setup (deterministic, synthetic) and conversion to kernel layout
# ---------------------------------------------------------------------------
def make_params(key, in_channels, out_channels):
    c0 = in_channels
    c1 = in_channels // 4
    c2 = in_channels // 16
    c3 = out_channels
    ks = jax.random.split(key, 10)

    def conv_w(k, co, ci):            # PyTorch layout (Cout, Cin, 3)
        return 0.1 * jax.random.normal(k, (co, ci, 3), jnp.float32)

    w1 = conv_w(ks[0], c1, c0); b1 = 0.1 * jax.random.normal(ks[1], (c1,), jnp.float32)
    w2 = conv_w(ks[2], c2, c1); b2 = 0.1 * jax.random.normal(ks[3], (c2,), jnp.float32)
    w3 = conv_w(ks[4], c3, c2); b3 = 0.1 * jax.random.normal(ks[5], (c3,), jnp.float32)

    def bn(kg, kb, c):
        gamma = 1.0 + 0.1 * jax.random.normal(kg, (c,), jnp.float32)
        beta = 0.1 * jax.random.normal(kb, (c,), jnp.float32)
        mean = 0.05 * jax.random.normal(jax.random.fold_in(kg, 1), (c,), jnp.float32)
        var = 1.0 + 0.1 * jax.random.uniform(jax.random.fold_in(kb, 1), (c,), jnp.float32)
        return gamma, beta, mean, var

    bn2 = bn(ks[6], ks[7], c2)
    bn3 = bn(ks[8], ks[9], c3)
    return dict(w1=w1, b1=b1, w2=w2, b2=b2, w3=w3, b3=b3, bn2=bn2, bn3=bn3)


def kernel_params(p):
    """PyTorch-shaped params -> kernel layout.

    BN folded into weights/bias; the three conv taps are fused along the lane
    axis (each tap Cout zero-padded to a 128 multiple); Cin padded to a 128
    multiple; weights cast to bf16 once; biases packed into one f32 array.
    """
    def fold_bn(bn_p, bias):
        gamma, beta, mean, var = bn_p
        scale = gamma / jnp.sqrt(var + BN_EPS)
        return scale, (bias - mean) * scale + beta

    def fuse_conv(w, cin_pad, cout_pad, scale=None):
        # (Cout, Cin, 3) -> (cin_pad, 3 * cout_pad) bf16, taps concatenated
        # along lanes, each tap zero-padded to cout_pad (128-lane aligned).
        co, ci, _ = w.shape
        taps = []
        for t in range(3):
            wt = jnp.transpose(w[:, :, t])               # (Cin, Cout)
            if scale is not None:
                wt = wt * scale[None, :]
            wt = jnp.pad(wt, ((0, cin_pad - ci), (0, cout_pad - co)))
            taps.append(wt)
        return jnp.concatenate(taps, axis=1).astype(jnp.bfloat16)

    c1, c0 = p["w1"].shape[0], p["w1"].shape[1]
    c2 = p["w2"].shape[0]
    c3 = p["w3"].shape[0]
    c0p, c1p, c2p, c3p = (_pad_to(c, 128) for c in (c0, c1, c2, c3))

    s2, t2 = fold_bn(p["bn2"], p["b2"])
    s3, t3 = fold_bn(p["bn3"], p["b3"])
    w1f = fuse_conv(p["w1"], c0p, c1p)
    w2f = fuse_conv(p["w2"], c1p, c2p, s2)
    w3f = fuse_conv(p["w3"], c2p, c3p, s3)

    cmax = max(c1p, c2p, c3p)
    padb = lambda v: jnp.pad(v, (0, cmax - v.shape[0]))
    bias_pack = jnp.stack([padb(p["b1"]), padb(t2), padb(t3)]).astype(jnp.float32)
    return w1f, w2f, w3f, bias_pack, c3


# ---------------------------------------------------------------------------
# Pure-JAX reference mirroring the PyTorch module (eval-mode BN, f32 math)
# ---------------------------------------------------------------------------
def reference(x_nlc, p):
    x = jnp.transpose(x_nlc, (0, 2, 1))          # (N, C_in, L) == transpose(1, 2)

    def conv(x, w, b):
        y = jax.lax.conv_general_dilated(
            x, w, window_strides=(1,), padding=((1, 1),),
            dimension_numbers=("NCH", "OIH", "NCH"))
        return y + b[None, :, None]

    def bn(x, params):
        gamma, beta, mean, var = params
        return ((x - mean[None, :, None]) / jnp.sqrt(var[None, :, None] + BN_EPS)
                * gamma[None, :, None] + beta[None, :, None])

    def lrelu(x):
        return jnp.where(x > 0, x, LEAKY_SLOPE * x)

    h = lrelu(conv(x, p["w1"], p["b1"]))
    h = lrelu(bn(conv(h, p["w2"], p["b2"]), p["bn2"]))
    h = bn(conv(h, p["w3"], p["b3"]), p["bn3"])
    return h.reshape(h.shape[0], -1)


# ---------------------------------------------------------------------------
if __name__ == "__main__":
    key = jax.random.PRNGKey(0)
    k_x, k_p = jax.random.split(key)

    N, L = 6, 16                                  # N not a multiple of block_batch
    in_channels, out_channels = 128, 8            # (real model uses 514)

    x = jax.random.normal(k_x, (N, L, in_channels), jnp.float32)
    params = make_params(k_p, in_channels, out_channels)

    y = feature_extractor(x, kernel_params(params))
    y = jax.block_until_ready(y)

    y_ref = reference(x, params)
    assert y.shape == (N, out_channels * L), y.shape
    max_err = float(jnp.max(jnp.abs(y - y_ref)))
    # bf16 matmuls (f32 accumulation) vs an all-f32 reference.
    assert jnp.allclose(y, y_ref, atol=3e-2, rtol=3e-2), max_err

    print("KERNEL_OK")
</pallas_src>

<mosaic_0001>
module attributes {stable_mosaic.version = 11 : i64} {
  func.func @kernel(%arg0: i32, %arg1: memref<48x128xbf16, #tpu.memory_space<vmem>>, %arg2: memref<128x384xbf16, #tpu.memory_space<vmem>>, %arg3: memref<128x384xbf16, #tpu.memory_space<vmem>>, %arg4: memref<128x384xbf16, #tpu.memory_space<vmem>>, %arg5: memref<3x128xf32, #tpu.memory_space<vmem>>, %arg6: memref<1x8x48xf32, #tpu.memory_space<vmem>>) attributes {dimension_semantics = [#tpu.dimension_semantics<parallel>], iteration_bounds = array<i64: 2>, scalar_prefetch = 0 : i64, scratch_operands = 0 : i64, tpu.core_type = #tpu.core_type<tc>, window_params = [{transform_indices = @transform_0, window_bounds = array<i64: 48, 128>}, {pipeline_mode = #tpu.pipeline_mode<synchronous>, transform_indices = @transform_1, window_bounds = array<i64: 128, 384>}, {pipeline_mode = #tpu.pipeline_mode<synchronous>, transform_indices = @transform_2, window_bounds = array<i64: 128, 384>}, {pipeline_mode = #tpu.pipeline_mode<synchronous>, transform_indices = @transform_3, window_bounds = array<i64: 128, 384>}, {pipeline_mode = #tpu.pipeline_mode<synchronous>, transform_indices = @transform_4, window_bounds = array<i64: 3, 128>}, {transform_indices = @transform_5, window_bounds = array<i64: 1, 8, 48>}]} {
    %0 = tpu.iota {dimensions = array<i32: 0>} : vector<48x1xi32>
    %c15_i32 = arith.constant 15 : i32
    %1 = vector.broadcast %c15_i32 : i32 to vector<48x1xi32>
    %2 = arith.andi %0, %1 : vector<48x1xi32>
    %c0_i32 = arith.constant 0 : i32
    %3 = vector.broadcast %c0_i32 : i32 to vector<48x1xi32>
    %4 = arith.cmpi eq, %2, %3 : vector<48x1xi32>
    %c15_i32_0 = arith.constant 15 : i32
    %5 = vector.broadcast %c15_i32_0 : i32 to vector<48x1xi32>
    %6 = arith.cmpi eq, %2, %5 : vector<48x1xi32>
    %c0 = arith.constant 0 : index
    %c0_1 = arith.constant 0 : index
    %7 = vector.load %arg1[%c0, %c0_1] : memref<48x128xbf16, #tpu.memory_space<vmem>>, vector<48x128xbf16>
    %c0_2 = arith.constant 0 : index
    %c0_3 = arith.constant 0 : index
    %8 = vector.load %arg5[%c0_2, %c0_3] : memref<3x128xf32, #tpu.memory_space<vmem>>, vector<1x128xf32>
    %c1 = arith.constant 1 : index
    %c0_4 = arith.constant 0 : index
    %9 = vector.load %arg5[%c1, %c0_4] : memref<3x128xf32, #tpu.memory_space<vmem>>, vector<1x128xf32>
    %c2 = arith.constant 2 : index
    %c0_5 = arith.constant 0 : index
    %10 = vector.load %arg5[%c2, %c0_5] : memref<3x128xf32, #tpu.memory_space<vmem>>, vector<1x128xf32>
    %c0_6 = arith.constant 0 : index
    %c0_7 = arith.constant 0 : index
    %11 = vector.load %arg2[%c0_6, %c0_7] : memref<128x384xbf16, #tpu.memory_space<vmem>>, vector<128x384xbf16>
    %cst = arith.constant dense<0.000000e+00> : vector<48x384xf32>
    %12 = tpu.matmul %7, %11, %cst {dimension_numbers = #tpu.dot_dimension_numbers<[1], [0], [0], [1], [0, 0, 1, 1], [], []>} : vector<48x128xbf16>, vector<128x384xbf16>, vector<48x384xf32> -> vector<48x384xf32>
    %13 = vector.extract_strided_slice %12 {offsets = [0, 0], sizes = [48, 128], strides = [1, 1]} : vector<48x384xf32> to vector<48x128xf32>
    %14 = vector.extract_strided_slice %12 {offsets = [0, 128], sizes = [48, 128], strides = [1, 1]} : vector<48x384xf32> to vector<48x128xf32>
    %15 = vector.extract_strided_slice %12 {offsets = [0, 256], sizes = [48, 128], strides = [1, 1]} : vector<48x384xf32> to vector<48x128xf32>
    %c1_i32 = arith.constant 1 : i32
    %16 = tpu.dynamic_rotate %13 by %c1_i32 dim 0 : vector<48x128xf32>, i32 -> vector<48x128xf32>
    %c47_i32 = arith.constant 47 : i32
    %17 = tpu.dynamic_rotate %15 by %c47_i32 dim 0 : vector<48x128xf32>, i32 -> vector<48x128xf32>
    %cst_8 = arith.constant 0.000000e+00 : f32
    %18 = vector.shape_cast %4 : vector<48x1xi1> to vector<48x1xi1>
    %19 = vector.broadcast %18 : vector<48x1xi1> to vector<48x128xi1>
    %20 = vector.broadcast %cst_8 : f32 to vector<48x128xf32>
    %21 = arith.select %19, %20, %16 : vector<48x128xi1>, vector<48x128xf32>
    %22 = arith.addf %21, %14 : vector<48x128xf32>
    %cst_9 = arith.constant 0.000000e+00 : f32
    %23 = vector.shape_cast %6 : vector<48x1xi1> to vector<48x1xi1>
    %24 = vector.broadcast %23 : vector<48x1xi1> to vector<48x128xi1>
    %25 = vector.broadcast %cst_9 : f32 to vector<48x128xf32>
    %26 = arith.select %24, %25, %17 : vector<48x128xi1>, vector<48x128xf32>
    %27 = arith.addf %22, %26 : vector<48x128xf32>
    %28 = vector.broadcast %8 : vector<1x128xf32> to vector<48x128xf32>
    %29 = arith.addf %27, %28 : vector<48x128xf32>
    %cst_10 = arith.constant 0.000000e+00 : f32
    %30 = vector.broadcast %cst_10 : f32 to vector<48x128xf32>
    %31 = arith.cmpf ogt, %29, %30 : vector<48x128xf32>
    %cst_11 = arith.constant 2.000000e-01 : f32
    %32 = vector.broadcast %cst_11 : f32 to vector<48x128xf32>
    %33 = arith.mulf %32, %29 : vector<48x128xf32>
    %34 = arith.select %31, %29, %33 : vector<48x128xi1>, vector<48x128xf32>
    %35 = arith.truncf %34 : vector<48x128xf32> to vector<48x128xbf16>
    %c0_12 = arith.constant 0 : index
    %c0_13 = arith.constant 0 : index
    %36 = vector.load %arg3[%c0_12, %c0_13] : memref<128x384xbf16, #tpu.memory_space<vmem>>, vector<128x384xbf16>
    %cst_14 = arith.constant dense<0.000000e+00> : vector<48x384xf32>
    %37 = tpu.matmul %35, %36, %cst_14 {dimension_numbers = #tpu.dot_dimension_numbers<[1], [0], [0], [1], [0, 0, 1, 1], [], []>} : vector<48x128xbf16>, vector<128x384xbf16>, vector<48x384xf32> -> vector<48x384xf32>
    %38 = vector.extract_strided_slice %37 {offsets = [0, 0], sizes = [48, 128], strides = [1, 1]} : vector<48x384xf32> to vector<48x128xf32>
    %39 = vector.extract_strided_slice %37 {offsets = [0, 128], sizes = [48, 128], strides = [1, 1]} : vector<48x384xf32> to vector<48x128xf32>
    %40 = vector.extract_strided_slice %37 {offsets = [0, 256], sizes = [48, 128], strides = [1, 1]} : vector<48x384xf32> to vector<48x128xf32>
    %c1_i32_15 = arith.constant 1 : i32
    %41 = tpu.dynamic_rotate %38 by %c1_i32_15 dim 0 : vector<48x128xf32>, i32 -> vector<48x128xf32>
    %c47_i32_16 = arith.constant 47 : i32
    %42 = tpu.dynamic_rotate %40 by %c47_i32_16 dim 0 : vector<48x128xf32>, i32 -> vector<48x128xf32>
    %cst_17 = arith.constant 0.000000e+00 : f32
    %43 = vector.shape_cast %4 : vector<48x1xi1> to vector<48x1xi1>
    %44 = vector.broadcast %43 : vector<48x1xi1> to vector<48x128xi1>
    %45 = vector.broadcast %cst_17 : f32 to vector<48x128xf32>
    %46 = arith.select %44, %45, %41 : vector<48x128xi1>, vector<48x128xf32>
    %47 = arith.addf %46, %39 : vector<48x128xf32>
    %cst_18 = arith.constant 0.000000e+00 : f32
    %48 = vector.shape_cast %6 : vector<48x1xi1> to vector<48x1xi1>
    %49 = vector.broadcast %48 : vector<48x1xi1> to vector<48x128xi1>
    %50 = vector.broadcast %cst_18 : f32 to vector<48x128xf32>
    %51 = arith.select %49, %50, %42 : vector<48x128xi1>, vector<48x128xf32>
    %52 = arith.addf %47, %51 : vector<48x128xf32>
    %53 = vector.broadcast %9 : vector<1x128xf32> to vector<48x128xf32>
    %54 = arith.addf %52, %53 : vector<48x128xf32>
    %cst_19 = arith.constant 0.000000e+00 : f32
    %55 = vector.broadcast %cst_19 : f32 to vector<48x128xf32>
    %56 = arith.cmpf ogt, %54, %55 : vector<48x128xf32>
    %cst_20 = arith.constant 2.000000e-01 : f32
    %57 = vector.broadcast %cst_20 : f32 to vector<48x128xf32>
    %58 = arith.mulf %57, %54 : vector<48x128xf32>
    %59 = arith.select %56, %54, %58 : vector<48x128xi1>, vector<48x128xf32>
    %60 = arith.truncf %59 : vector<48x128xf32> to vector<48x128xbf16>
    %c0_21 = arith.constant 0 : index
    %c0_22 = arith.constant 0 : index
    %61 = vector.load %arg4[%c0_21, %c0_22] : memref<128x384xbf16, #tpu.memory_space<vmem>>, vector<128x384xbf16>
    %cst_23 = arith.constant dense<0.000000e+00> : vector<48x384xf32>
    %62 = tpu.matmul %60, %61, %cst_23 {dimension_numbers = #tpu.dot_dimension_numbers<[1], [0], [0], [1], [0, 0, 1, 1], [], []>} : vector<48x128xbf16>, vector<128x384xbf16>, vector<48x384xf32> -> vector<48x384xf32>
    %63 = vector.extract_strided_slice %62 {offsets = [0, 0], sizes = [48, 128], strides = [1, 1]} : vector<48x384xf32> to vector<48x128xf32>
    %64 = vector.extract_strided_slice %62 {offsets = [0, 128], sizes = [48, 128], strides = [1, 1]} : vector<48x384xf32> to vector<48x128xf32>
    %65 = vector.extract_strided_slice %62 {offsets = [0, 256], sizes = [48, 128], strides = [1, 1]} : vector<48x384xf32> to vector<48x128xf32>
    %c1_i32_24 = arith.constant 1 : i32
    %66 = tpu.dynamic_rotate %63 by %c1_i32_24 dim 0 : vector<48x128xf32>, i32 -> vector<48x128xf32>
    %c47_i32_25 = arith.constant 47 : i32
    %67 = tpu.dynamic_rotate %65 by %c47_i32_25 dim 0 : vector<48x128xf32>, i32 -> vector<48x128xf32>
    %cst_26 = arith.constant 0.000000e+00 : f32
    %68 = vector.shape_cast %4 : vector<48x1xi1> to vector<48x1xi1>
    %69 = vector.broadcast %68 : vector<48x1xi1> to vector<48x128xi1>
    %70 = vector.broadcast %cst_26 : f32 to vector<48x128xf32>
    %71 = arith.select %69, %70, %66 : vector<48x128xi1>, vector<48x128xf32>
    %72 = arith.addf %71, %64 : vector<48x128xf32>
    %cst_27 = arith.constant 0.000000e+00 : f32
    %73 = vector.shape_cast %6 : vector<48x1xi1> to vector<48x1xi1>
    %74 = vector.broadcast %73 : vector<48x1xi1> to vector<48x128xi1>
    %75 = vector.broadcast %cst_27 : f32 to vector<48x128xf32>
    %76 = arith.select %74, %75, %67 : vector<48x128xi1>, vector<48x128xf32>
    %77 = arith.addf %72, %76 : vector<48x128xf32>
    %78 = vector.broadcast %10 : vector<1x128xf32> to vector<48x128xf32>
    %79 = arith.addf %77, %78 : vector<48x128xf32>
    %80 = vector.extract_strided_slice %79 {offsets = [0, 0], sizes = [48, 8], strides = [1, 1]} : vector<48x128xf32> to vector<48x8xf32>
    %81 = tpu.transpose %80, [1, 0] : vector<48x8xf32> -> vector<8x48xf32>
    %c0_28 = arith.constant 0 : index
    %c0_29 = arith.constant 0 : index
    %c0_30 = arith.constant 0 : index
    %82 = vector.load %arg6[%c0_28, %c0_29, %c0_30] : memref<1x8x48xf32, #tpu.memory_space<vmem>>, vector<1x8x48xf32>
    %83 = vector.shape_cast %82 : vector<1x8x48xf32> to vector<8x48xf32>
    %84 = vector.shape_cast %81 : vector<8x48xf32> to vector<1x8x48xf32>
    tpu.vector_store %arg6[%c0_28, %c0_29, %c0_30], %84 {strides = array<i32>} : memref<1x8x48xf32, #tpu.memory_space<vmem>>, vector<1x8x48xf32>,
    return
  }
  func.func @transform_0(%arg0: i32) -> (i32, i32) {
    %c0_i32 = arith.constant 0 : i32
    %c0_i32_0 = arith.constant 0 : i32
    return %arg0, %c0_i32 : i32, i32
  }
  func.func @transform_1(%arg0: i32) -> (i32, i32) {
    %c0_i32 = arith.constant 0 : i32
    %c0_i32_0 = arith.constant 0 : i32
    %c0_i32_1 = arith.constant 0 : i32
    return %c0_i32, %c0_i32_0 : i32, i32
  }
  func.func @transform_2(%arg0: i32) -> (i32, i32) {
    %c0_i32 = arith.constant 0 : i32
    %c0_i32_0 = arith.constant 0 : i32
    %c0_i32_1 = arith.constant 0 : i32
    return %c0_i32, %c0_i32_0 : i32, i32
  }
  func.func @transform_3(%arg0: i32) -> (i32, i32) {
    %c0_i32 = arith.constant 0 : i32
    %c0_i32_0 = arith.constant 0 : i32
    %c0_i32_1 = arith.constant 0 : i32
    return %c0_i32, %c0_i32_0 : i32, i32
  }
  func.func @transform_4(%arg0: i32) -> (i32, i32) {
    %c0_i32 = arith.constant 0 : i32
    %c0_i32_0 = arith.constant 0 : i32
    %c0_i32_1 = arith.constant 0 : i32
    return %c0_i32, %c0_i32_0 : i32, i32
  }
  func.func @transform_5(%arg0: i32) -> (i32, i32, i32) {
    %c0_i32 = arith.constant 0 : i32
    %c0_i32_0 = arith.constant 0 : i32
    %c0_i32_1 = arith.constant 0 : i32
    return %arg0, %c0_i32, %c0_i32_0 : i32, i32, i32
  }
}

</mosaic_0001>

<bundles_post_ra>
// kernel: tpu_custom_call.1
= control target key start
LH: loop header
LB: loop body
LE: loop exit
PB: predicated region body
PF: predicated region fallthrough
CT: control target
= control target key end

     0   :  { %10 = vsyncpa [#allocation3], 0  ;;  %s2610_s0 = inlined_call_operand.hbm [shape: bf16[96,128], index: 0, kind: input, shape index: {}]   ;;  %s2611_s1 = inlined_call_operand.hbm [shape: bf16[128,384], index: 1, kind: input, shape index: {}]   ;;  %s2612_s2 = inlined_call_operand.hbm [shape: bf16[128,384], index: 2, kind: input, shape index: {}]   ;;  %s2613_s3 = inlined_call_operand.hbm [shape: bf16[128,384], index: 3, kind: input, shape index: {}]   ;;  %s2614_s4 = inlined_call_operand.vmem [shape: f32[3,128], index: 4, kind: input, shape index: {}]   ;;  %s2615_s5 = inlined_call_operand.hbm [shape: f32[2,8,48], index: 5, kind: output, shape index: {}]  }
   0x1   :  { %12 = vsyncpa [#allocation3 + $0x1], 0 }
   0x2   :  { %13 = vsyncpa [#allocation6], 0 }
   0x3   :  { %14 = vsyncpa [#allocation9], 0 }
   0x4   :  { %15 = vsyncpa [#allocation4], 0 }
   0x5   :  { %17 = vsyncpa [#allocation4 + $0x1], 0  ;;  %s2189_s18 = smov 0   ;;  %s2191_s19 = smov 0  }
   0x6   :  { %s2193_s20 = smov 0   ;;  %s2195_s21 = smov 0  }
   0x7 LB: > { %s2210_s22 = sadd.s32 4294967295, %s2145_s21   ;;  %s1570_s23 = sadd.s32 4294967294, %s2145_s21   ;;  %s2145_s21 = sphi %s2195_s21, %s2651_s21   ;;  %s2141_s20 = sphi %s2193_s20, %s2650_s20   ;;  %s2137_s19 = sphi %s2191_s19, %s2649_s19   ;;  %s2133_s18 = sphi %s2189_s18, %s2648_s18  }
   0x8   : > { %p43_p0 = scmp.ne.s32.totalorder %s2137_s19, %s2133_s18  ;;  %p2616_p1 = scmp.eq.s32.totalorder %s2210_s22, 0 }
   0x9   : > { %p157_p3 = scmp.eq.s32.totalorder %s1570_s23, 1  ;;  %p1571_p5 = scmp.ge.s32.totalorder %s2145_s21, 1 }
   0xa   : > { %p2219_p4 = por %p2616_p1, %p43_p0  ;;  %p164_p7 = scmp.lt.s32.totalorder %s2145_s21, 3 }
   0xb   : > { %p2224_p6 = por %p157_p3, %p43_p0  ;;  %s2147_s27 = smov [#allocation5]  }
   0xc   : > { %s2620_s24 = scalar_select %p2219_p4, 1, 0 }
   0xd   : > { %s2621_s25 = scalar_select %p2224_p6, 1, 0 }
   0xe   : > { %p2229_p8 = pnand %p1571_p5, %p164_p7  ;;  %s176_s28 = sshll.u32 %s2147_s27, 4  ;;  %s177_s28 = int_to_ptr.vmem [resolvable:$true] %s176_s28 }
   0xf   : > { %s2148_s30 = smov [#allocation7]   ;;  %s2149_s7 = smov [#allocation8]  }
  0x10   : > { %s2622_s26 = scalar_select %p2229_p8, 1, 0 }
  0x11   : > { %p1800_p9 = pneg %p2229_p8  ;;  %s189_s6 = sshll.u32 %s2148_s30, 4  ;;  %s190_s6 = int_to_ptr.vmem [resolvable:$true] %s189_s6 }
  0x12   : > { %s202_s8 = sshll.u32 %s2149_s7, 4  ;;  %s1978_s9 = scalar_lea.vmem %s177_s28, 3072  ;;  %s203_s8 = int_to_ptr.vmem [resolvable:$true] %s202_s8 }
  0x13   : > { %p2238_p11 = pnand %p1800_p9, %p2616_p1  ;;  %p1979_p13 = scmp.ne.s32.totalorder %s177_s28, %s1978_s9 }
  0x14   : > { %p1986_p5 = scmp.lt.s32.totalorder %s177_s28, %s177_s28  ;;  %p1987_p7 = scmp.lt.s32.totalorder %s1978_s9, %s1978_s9 }
  0x15   : > { %p1969_p12 = pneg %p2238_p11 }
  0x16   : > { %p1988_p9 = por %p1987_p7, %p1986_p5 }
  0x17   : > { %p1981_p0 = pnand %p1979_p13, %p1969_p12 }
  0x19   : > { %p1982_p3 = pneg %p1981_p0 }
  0x1b   : > { %p1989_p10 = pnand %p1988_p9, %p1982_p3 }
  0x1d   : > { %1992 = shalt.err (!%p1989_p10)
}
  0x1e   : > { %s2150_s10 = smov 192   ;;  %s2151_s11 = smov 12  }
  0x1f   : > { %1803 = dma.hbm_to_vmem [thread:$0]  (!%p2238_p11), %s2611_s1, 3072, %s177_s28, [#allocation6], %s2150_s10, %s2150_s10, %s2151_s11  }
  0x20   : > { %s2004_s14 = scalar_lea.vmem %s190_s6, 3072  ;;  %p2012_p2 = scmp.lt.s32.totalorder %s190_s6, %s190_s6 }
  0x21   : > { %p2005_p1 = scmp.ne.s32.totalorder %s190_s6, %s2004_s14  ;;  %p2013_p6 = scmp.lt.s32.totalorder %s2004_s14, %s2004_s14 }
  0x23   : > { %p2007_p13 = pnand %p2005_p1, %p1969_p12  ;;  %p2014_p5 = por %p2013_p6, %p2012_p2 }
  0x25   : > { %p2008_p0 = pneg %p2007_p13 }
  0x27   : > { %p2015_p3 = pnand %p2014_p5, %p2008_p0 }
  0x29   : > { %2018 = shalt.err (!%p2015_p3)
}
  0x2a   : > { %1806 = dma.hbm_to_vmem [thread:$0]  (!%p2238_p11), %s2612_s2, 3072, %s190_s6, [#allocation6], %s2150_s10, %s2150_s10, %s2151_s11  }
  0x2b   : > { %s2030_s17 = scalar_lea.vmem %s203_s8, 3072  ;;  %p2038_p9 = scmp.lt.s32.totalorder %s203_s8, %s203_s8 }
  0x2c   : > { %p2031_p10 = scmp.ne.s32.totalorder %s203_s8, %s2030_s17  ;;  %p2039_p13 = scmp.lt.s32.totalorder %s2030_s17, %s2030_s17 }
  0x2e   : > { %p2033_p7 = pnand %p2031_p10, %p1969_p12  ;;  %p2040_p4 = por %p2039_p13, %p2038_p9 }
  0x30   : > { %p2034_p1 = pneg %p2033_p7 }
  0x32   : > { %p2041_p2 = pnand %p2040_p4, %p2034_p1 }
  0x34   : > { %2044 = shalt.err (!%p2041_p2)
}
  0x35   : > { %1809 = dma.hbm_to_vmem [thread:$0]  (!%p2238_p11), %s2613_s3, 3072, %s203_s8, [#allocation9], %s2150_s10, %s2150_s10, %s2151_s11  }
  0x36   : > { %s2269_s28 = sadd.s32 1, %s2145_s21   ;;  %s30_s29 = sadd.s32 1, %s2141_s20 }
  0x37   : > { %s27_s30 = ssub.s32 %s2145_s21, %s2269_s28  ;;  %p37_p6 = scmp.ne.s32.totalorder %s2141_s20, %s2137_s19 }
  0x38   : > { %p28_p4 = scmp.eq.s32.totalorder %s27_s30, 0  ;;  %p38_p12 = scmp.eq.s32.totalorder %s2145_s21, 0 }
  0x39   : > { %p1821_p0 = scmp.lt.s32.totalorder %s2145_s21, 2  ;;  %p2624_p3 = scmp.eq.s32.totalorder %s2210_s22, 1 }
  0x3a   : > { %s2279_s6 = scalar_select %p28_p4, %s2141_s20, %s30_s29  }
  0x3b   : > { %p39_p5 = por %p38_p12, %p37_p6  ;;  %p2283_p10 = por %p2624_p3, %p37_p6 }
  0x3c   : > { %s219_s9 = sand.u32 1, %s2141_s20   ;;  %s1664_s12 = smul.u32 384, %s2145_s21 }
  0x3d   : > { %s2625_s7 = scalar_select %p2283_p10, 1, 0 }
  0x3e   : > { %s1782_s8 = smul.u32 24, %s219_s9  ;;  %s2292_s13 = scalar_lea.hbm %s2610_s0, %s1664_s12 }
  0x3f   : > { %p2294_p11 = pnand %p1821_p0, %p39_p5  ;;  %s2300_s17 = scalar_lea.sflag [#allocation3], %s219_s9 }
  0x40   : > { %s223_s15 = scalar_lea.vmem [#allocation2], %s1782_s8  ;;  %s2045_s23 = scalar_lea.hbm %s2292_s13, 384 }
  0x41   : > { %s230_s16 = sshll.u32 %s223_s15, 4  ;;  %p2046_p7 = scmp.ne.s32.totalorder %s2292_s13, %s2045_s23  ;;  %s2298_s16 = int_to_ptr.vmem [resolvable:$true] %s230_s16 }
  0x42   : > { %p2047_p1 = pneg %p2294_p11  ;;  %s2050_s29 = scalar_lea.hbm %s2610_s0, 768 }
  0x43   : > { %p2051_p2 = scmp.lt.s32.totalorder %s2292_s13, %s2610_s0  ;;  %p2052_p4 = scmp.lt.s32.totalorder %s2050_s29, %s2045_s23 }
  0x44   : > { %p2048_p9 = pnand %p2047_p1, %p2046_p7 }
  0x45   : > { %p2053_p6 = por %p2052_p4, %p2051_p2 }
  0x46   : > { %p2049_p13 = pneg %p2048_p9 }
  0x48   : > { %p2054_p12 = pnand %p2053_p6, %p2049_p13 }
  0x4a   : > { %2057 = shalt.err (!%p2054_p12)
}
  0x4b   : > { %s2058_s9 = scalar_lea.vmem %s2298_s16, 384  ;;  %s2152_s8 = smov [#allocation2]  }
  0x4c   : > { %p2059_p0 = scmp.ne.s32.totalorder %s2298_s16, %s2058_s9  ;;  %s2063_s11 = sshll.u32 %s2152_s8, 4  ;;  %s2064_s11 = int_to_ptr.vmem [resolvable:$false] %s2063_s11 }
  0x4d   : > { %s2065_s15 = scalar_lea.vmem %s2064_s11, 768  ;;  %p2066_p7 = scmp.lt.s32.totalorder %s2298_s16, %s2064_s11 }
  0x4e   : > { %p2061_p5 = pnand %p2059_p0, %p2047_p1  ;;  %p2067_p9 = scmp.lt.s32.totalorder %s2065_s15, %s2058_s9 }
  0x50   : > { %p2062_p3 = pneg %p2061_p5  ;;  %p2068_p10 = por %p2067_p9, %p2066_p7 }
  0x52   : > { %p2069_p8 = pnand %p2068_p10, %p2062_p3 }
  0x54   : > { %2072 = shalt.err (!%p2069_p8)
}
  0x55   : > { %s2153_s23 = smov 64   ;;  %s2154_s27 = smov 4  }
  0x56   : > { %1813 = dma.hbm_to_vmem [thread:$0]  (!%p2294_p11), %s2292_s13, 384, %s2298_s16, %s2300_s17, %s2153_s23, %s2153_s23, %s2154_s27  }
  0x57   : > { %p2627_p1 = scmp.ne.s32.totalorder %s2622_s26, 0 }
  0x58   : > { %s2324_s30 = sand.u32 (!%p2627_p1), 1, %s2137_s19   ;;  %p2628_p8 = scmp.ne.s32.totalorder (!%p2627_p1), %s2620_s24, 0 }
  0x59   : > { %242 = sbr.rel (%p2627_p1) target bundleno = 952 (0x3b8), region = 40  ;;  %s245_s12 = scalar_lea.sflag (!%p2627_p1), [#allocation3], %s2324_s30 }
  0x5a   : > { %s1783_s29 = smul.u32 (!%p2627_p1), 24, %s2324_s30 }
  0x5c   : > { %s2328_s10 = scalar_lea.vmem (!%p2627_p1), [#allocation2], %s1783_s29 }
  0x5e   : > { %2116 = dma.done.wait (%p2628_p8), %s245_s12, 384  }
  0x5f   : > { %2118 = vsyncadd (%p2628_p8), %s245_s12, 4294966912  ;;  %p2629_p10 = scmp.eq.s32.totalorder %s2210_s22, 0 }
  0x61   : > { %2120 = dma.done.wait (%p2629_p10), [#allocation6], 6144   ;;  %p2630_p11 = pmov %p2629_p10 }
  0x62   : > { %p2631_p13 = pmov %p2629_p10 }
  0x63   : > { %2122 = vsyncadd (%p2630_p11), [#allocation6], 4294961152 }
  0x64   : > { %2124 = dma.done.wait (%p2631_p13), [#allocation9], 3072   ;;  %p2632_p2 = pmov %p2629_p10 }
  0x65   : > { %v2155_v0 = vmov 0.0   ;;  %vm2156_vm0 = vmmov 0   ;;  %v2157_v1 = vmov 0   ;;  %v1868_v2 = vld [vmem:[#allocation5 + $0xac] ss:$12 sps:$4 sm:$0xff]   ;;  %v289_v54 = vlaneseq  ;;  %s1581_s9 = sshll.u32 %s2324_s30, 3 }
  0x66   : > { %2126 = vsyncadd (%p2632_p2), [#allocation9], 4294964224  ;;  %1698 = vmatprep.subr.bf16.mxu1 %v2155_v0  ;;  %1714 = vmatprep.mubr.msk.bf16.mxu1 %vm2156_vm0, %v2155_v0  ;;  %v1870_v3 = vld [vmem:[#allocation5 + $0xb0] ss:$12 sps:$4 sm:$0xff]   ;;  %v1871_v4 = vld [vmem:[#allocation5 + $0xa8] ss:$12 sps:$4 sm:$0xff]  }
  0x67   : > { %533 = vmatprep.mubr.bf16.mxu0 %v2157_v1  ;;  %501 = vmatprep.subr.bf16.mxu0 %v1868_v2  ;;  %v1872_v5 = vld [vmem:[#allocation5 + $0x94] ss:$12 sps:$4 sm:$0xff]   ;;  %v1874_v6 = vld [vmem:[#allocation5 + $0x98] ss:$12 sps:$4 sm:$0xff]   ;;  %v1875_v7 = vld [vmem:[#allocation5 + $0x90] ss:$12 sps:$4 sm:$0xff]  }
  0x68   : > { %1699 = vmatpush3.bf16.msra.mxu1 %v1870_v3  ;;  %502 = vmatpush1.bf16.msra.mxu0 %v1871_v4  ;;  %v1876_v8 = vld [vmem:[#allocation5 + $0x7c] ss:$12 sps:$4 sm:$0xff]   ;;  %v1878_v9 = vld [vmem:[#allocation5 + $0x80] ss:$12 sps:$4 sm:$0xff]   ;;  %v1879_v10 = vld [vmem:[#allocation5 + $0x78] ss:$12 sps:$4 sm:$0xff]  }
  0x69   : > { %1700 = vmatprep.subr.bf16.mxu1 %v2155_v0  ;;  %503 = vmatprep.subr.bf16.mxu0 %v1872_v5  ;;  %v1880_v11 = vld [vmem:[#allocation5 + $0x64] ss:$12 sps:$4 sm:$0xff]   ;;  %v1882_v12 = vld [vmem:[#allocation5 + $0x68] ss:$12 sps:$4 sm:$0xff]   ;;  %v1883_v13 = vld [vmem:[#allocation5 + $0x60] ss:$12 sps:$4 sm:$0xff]  }
  0x6a   : > { %v1884_v14 = vld [vmem:[#allocation5 + $0x4c] ss:$12 sps:$4 sm:$0xff]   ;;  %v1886_v15 = vld [vmem:[#allocation5 + $0x50] ss:$12 sps:$4 sm:$0xff]   ;;  %v1887_v16 = vld [vmem:[#allocation5 + $0x48] ss:$12 sps:$4 sm:$0xff]  }
  0x6b   : > { %v1888_v17 = vld [vmem:[#allocation5 + $0x34] ss:$12 sps:$4 sm:$0xff]   ;;  %v1890_v18 = vld [vmem:[#allocation5 + $0x38] ss:$12 sps:$4 sm:$0xff]   ;;  %v1891_v19 = vld [vmem:[#allocation5 + $0x30] ss:$12 sps:$4 sm:$0xff]  }
  0x6c   : > { %1701 = vmatpush3.bf16.msra.mxu1 %v1874_v6  ;;  %504 = vmatpush1.bf16.msra.mxu0 %v1875_v7  ;;  %v1892_v20 = vld [vmem:[#allocation5 + $0x1c] ss:$12 sps:$4 sm:$0xff]   ;;  %v1894_v21 = vld [vmem:[#allocation5 + $0x20] ss:$12 sps:$4 sm:$0xff]   ;;  %v1895_v22 = vld [vmem:[#allocation5 + $0x18] ss:$12 sps:$4 sm:$0xff]  }
  0x6d   : > { %1702 = vmatprep.subr.bf16.mxu1 %v2155_v0  ;;  %505 = vmatprep.subr.bf16.mxu0 %v1876_v8  ;;  %v1896_v23 = vld [vmem:[#allocation5 + $0x4] ss:$12 sps:$4 sm:$0xff]   ;;  %v1898_v24 = vld [vmem:[#allocation5 + $0x8] ss:$12 sps:$4 sm:$0xff]   ;;  %v1899_v25 = vld [vmem:[#allocation5] ss:$12 sps:$4 sm:$0xff]  }
  0x6e   : > { %v1900_v26 = vld [vmem:[%s2328_s10] sm:$0xff]   ;;  %v1901_v27 = vld [vmem:[%s2328_s10 + $0x8] sm:$0xff]   ;;  %v1902_v28 = vld [vmem:[%s2328_s10 + $0x10] sm:$0xff]   ;;  %v2380_v58 = vshrl.u32 %v289_v54, 7  ;;  %s1661_s8 = sshll.u32 %s2210_s22, 7  ;;  %s286_s11 = scalar_lea.vmem [#allocation10], %s1581_s9 }
  0x6f   : > { %v1905_v29 = vld [vmem:[#allocation7 + $0xac] ss:$12 sps:$4 sm:$0xff]   ;;  %v1903_v30 = vld [vmem:[#allocation7 + $0xa8] ss:$12 sps:$4 sm:$0xff]   ;;  %v1906_v31 = vld [vmem:[#allocation7 + $0xb0] ss:$12 sps:$4 sm:$0xff]   ;;  %s2573_s29 = scalar_lea.hbm %s2615_s5, %s1661_s8 }
  0x70   : > { %1703 = vmatpush3.bf16.msra.mxu1 %v1878_v9  ;;  %506 = vmatpush1.bf16.msra.mxu0 %v1879_v10  ;;  %v1909_v32 = vld [vmem:[#allocation7 + $0x94] ss:$12 sps:$4 sm:$0xff]   ;;  %v1907_v33 = vld [vmem:[#allocation7 + $0x90] ss:$12 sps:$4 sm:$0xff]   ;;  %v1910_v34 = vld [vmem:[#allocation7 + $0x98] ss:$12 sps:$4 sm:$0xff]  }
  0x71   : > { %1704 = vmatprep.subr.bf16.mxu1 %v2155_v0  ;;  %507 = vmatprep.subr.bf16.mxu0 %v1880_v11  ;;  %v1913_v35 = vld [vmem:[#allocation7 + $0x7c] ss:$12 sps:$4 sm:$0xff]   ;;  %v1911_v36 = vld [vmem:[#allocation7 + $0x78] ss:$12 sps:$4 sm:$0xff]   ;;  %v1914_v37 = vld [vmem:[#allocation7 + $0x80] ss:$12 sps:$4 sm:$0xff]  }
  0x72   : > { %v1917_v38 = vld [vmem:[#allocation7 + $0x64] ss:$12 sps:$4 sm:$0xff]   ;;  %v1915_v39 = vld [vmem:[#allocation7 + $0x60] ss:$12 sps:$4 sm:$0xff]   ;;  %v1918_v40 = vld [vmem:[#allocation7 + $0x68] ss:$12 sps:$4 sm:$0xff]  }
  0x73   : > { %v1921_v41 = vld [vmem:[#allocation7 + $0x4c] ss:$12 sps:$4 sm:$0xff]   ;;  %v1919_v42 = vld [vmem:[#allocation7 + $0x48] ss:$12 sps:$4 sm:$0xff]   ;;  %v1922_v43 = vld [vmem:[#allocation7 + $0x50] ss:$12 sps:$4 sm:$0xff]  }
  0x74   : > { %1705 = vmatpush3.bf16.msra.mxu1 %v1882_v12  ;;  %508 = vmatpush1.bf16.msra.mxu0 %v1883_v13  ;;  %v1925_v44 = vld [vmem:[#allocation7 + $0x34] ss:$12 sps:$4 sm:$0xff]   ;;  %v1923_v45 = vld [vmem:[#allocation7 + $0x30] ss:$12 sps:$4 sm:$0xff]   ;;  %v1926_v46 = vld [vmem:[#allocation7 + $0x38] ss:$12 sps:$4 sm:$0xff]  }
  0x75   : > { %1706 = vmatprep.subr.bf16.mxu1 %v2155_v0  ;;  %509 = vmatprep.subr.bf16.mxu0 %v1884_v14  ;;  %v1929_v47 = vld [vmem:[#allocation7 + $0x1c] ss:$12 sps:$4 sm:$0xff]   ;;  %v1927_v48 = vld [vmem:[#allocation7 + $0x18] ss:$12 sps:$4 sm:$0xff]   ;;  %v1930_v49 = vld [vmem:[#allocation7 + $0x20] ss:$12 sps:$4 sm:$0xff]  }
  0x76   : > { %v1933_v50 = vld [vmem:[#allocation7 + $0x4] ss:$12 sps:$4 sm:$0xff]   ;;  %v1931_v51 = vld [vmem:[#allocation7] ss:$12 sps:$4 sm:$0xff]   ;;  %v1934_v52 = vld [vmem:[#allocation7 + $0x8] ss:$12 sps:$4 sm:$0xff]  }
  0x77   : > { %v291_v63 = vadd.s32 8, %v2380_v58  ;;  %v292_v9 = vadd.s32 16, %v2380_v58  ;;  %vm640_vm1 = vcmp.lt.s32.totalorder %v2380_v58, 7  ;;  %v293_v13 = vadd.s32 24, %v2380_v58  ;;  %s1471_s15 = sshll.u32 %s286_s11, 4  ;;  %s1458_s12 = scalar_lea.sflag [#allocation4], %s2324_s30  ;;  %s1472_s15 = int_to_ptr.vmem [resolvable:$true] %s1471_s15 }
  0x78   : > { %1707 = vmatpush3.bf16.msra.mxu1 %v1886_v15  ;;  %510 = vmatpush1.bf16.msra.mxu0 %v1887_v16  ;;  %vm627_vm2 = vcmp.lt.s32.totalorder %v2380_v58, 1  ;;  %s2073_s10 = scalar_lea.vmem %s1472_s15, 128  ;;  %p2645_p6 = scmp.ne.s32.totalorder %s2625_s7, 0 }
  0x79   : > { %1708 = vmatprep.subr.bf16.mxu1 %v2155_v0  ;;  %511 = vmatprep.subr.bf16.mxu0 %v1888_v17  ;;  %v297_v7 = vand.u32 15, %v291_v63  ;;  %p2074_p4 = scmp.ne.s32.totalorder %s1472_s15, %s2073_s10  ;;  %s2158_s24 = smov [#allocation10]  }
  0x7a   : > { %s2077_s26 = sshll.u32 %s2158_s24, 4  ;;  %s2078_s26 = int_to_ptr.vmem [resolvable:$false] %s2077_s26 }
  0x7b   : > { %vm2391_vm3 = vcmp.eq.s32.totalorder %v297_v7, 15  ;;  %p2075_p12 = pnand %p2074_p4, %p2645_p6  ;;  %s2079_s22 = scalar_lea.vmem %s2078_s26, 256 }
  0x7c   : > { %1709 = vmatpush3.bf16.msra.mxu1 %v1890_v18  ;;  %512 = vmatpush1.bf16.msra.mxu0 %v1891_v19  ;;  %p2080_p5 = scmp.lt.s32.totalorder %s1472_s15, %s2078_s26  ;;  %p2081_p3 = scmp.lt.s32.totalorder %s2079_s22, %s2073_s10 }
  0x7d   : > { %1710 = vmatprep.subr.bf16.mxu1 %v2155_v0  ;;  %513 = vmatprep.subr.bf16.mxu0 %v1892_v20  ;;  %v298_v20 = vand.u32 15, %v292_v9  ;;  %p2076_p0 = pneg %p2075_p12 }
  0x7e   : > { %p2082_p7 = por %p2081_p3, %p2080_p5 }
  0x7f   : > { %vm2405_vm4 = vcmp.eq.s32.totalorder %v298_v20, 0 }
  0x80   : > { %1711 = vmatpush3.bf16.msra.mxu1 %v1894_v21  ;;  %514 = vmatpush1.bf16.msra.mxu0 %v1895_v22  ;;  %p2083_p9 = pnand %p2082_p7, %p2076_p0 }
  0x81   : > { %1712 = vmatprep.subr.bf16.mxu1 %v2155_v0  ;;  %515 = vmatprep.subr.bf16.mxu0 %v1896_v23  ;;  %v299_v23 = vand.u32 15, %v293_v13 }
  0x83   : > { %vm2412_vm5 = vcmp.eq.s32.totalorder %v299_v23, 15 }
  0x84   : > { %1713 = vmatpush3.bf16.msra.mxu1 %v1898_v24  ;;  %516 = vmatpush1.bf16.msra.mxu0 %v1899_v25 }
  0x85   : > { %1726 = vmatprep.subr.bf16.mxu1 %v2155_v0  ;;  %886 = vmatprep.subr.bf16.mxu0 %v1905_v29 }
  0x87   : > { %1715 = vmatmul.mubr.bf16.vlgmr.msra.gmra.mxu1 %v1900_v26  ;;  %534 = vmatmul.mubr.bf16.vlgmr.msra.gmra.mxu0 %v1900_v26 }
  0x88   : > { %1718 = vmatprep.mubr.msk.bf16.mxu1 %vm2156_vm0, %v2155_v0  ;;  %543 = vmatprep.mubr.bf16.mxu0 %v2157_v1 }
  0x89   : > { %887 = vmatpush1.bf16.msra.mxu0 %v1903_v30  ;;  %1727 = vmatpush3.bf16.msra.mxu1 %v1906_v31 }
  0x8a   : > { %1728 = vmatprep.subr.bf16.mxu1 %v2155_v0  ;;  %888 = vmatprep.subr.bf16.mxu0 %v1909_v32 }
  0x8d   : > { %889 = vmatpush1.bf16.msra.mxu0 %v1907_v33  ;;  %1729 = vmatpush3.bf16.msra.mxu1 %v1910_v34 }
  0x8e   : > { %1730 = vmatprep.subr.bf16.mxu1 %v2155_v0  ;;  %890 = vmatprep.subr.bf16.mxu0 %v1913_v35  ;;  %v294_v35 = vadd.s32 32, %v2380_v58 }
  0x8f   : > { %1719 = vmatmul.mubr.bf16.gmra.mxu1 %v1901_v27  ;;  %544 = vmatmul.mubr.bf16.gmra.mxu0 %v1901_v27 }
  0x90   : > { %1722 = vmatprep.mubr.msk.bf16.mxu1 %vm2156_vm0, %v2155_v0  ;;  %553 = vmatprep.mubr.bf16.mxu0 %v2157_v1 }
  0x91   : > { %891 = vmatpush1.bf16.msra.mxu0 %v1911_v36  ;;  %1731 = vmatpush3.bf16.msra.mxu1 %v1914_v37 }
  0x92   : > { %1732 = vmatprep.subr.bf16.mxu1 %v2155_v0  ;;  %892 = vmatprep.subr.bf16.mxu0 %v1917_v38 }
  0x95   : > { %893 = vmatpush1.bf16.msra.mxu0 %v1915_v39  ;;  %1733 = vmatpush3.bf16.msra.mxu1 %v1918_v40 }
  0x96   : > { %1734 = vmatprep.subr.bf16.mxu1 %v2155_v0  ;;  %894 = vmatprep.subr.bf16.mxu0 %v1921_v41 }
  0x97   : > { %1723 = vmatmul.mubr.bf16.gmra.mxu1 %v1902_v28  ;;  %554 = vmatmul.mubr.bf16.gmra.mxu0 %v1902_v28  ;;  %v296_v28 = vand.u32 15, %v2380_v58 }
  0x98   : > { %1742 = vmatprep.mubr.msk.bf16.mxu1 %vm2156_vm0, %v2155_v0  ;;  %918 = vmatprep.mubr.bf16.mxu0 %v2157_v1 }
  0x99   : > { %895 = vmatpush1.bf16.msra.mxu0 %v1919_v42  ;;  %1735 = vmatpush3.bf16.msra.mxu1 %v1922_v43  ;;  %vm2420_vm6 = vcmp.eq.s32.totalorder %v296_v28, 0  ;;  %v1659_v42 = vld [vmem:[%s2614_s4 + $0x2] ss:$0 sm:$0xff] }
  0x9a   : > { %1736 = vmatprep.subr.bf16.mxu1 %v2155_v0  ;;  %896 = vmatprep.subr.bf16.mxu0 %v1925_v44 }
  0x9d   : > { %897 = vmatpush1.bf16.msra.mxu0 %v1923_v45  ;;  %1737 = vmatpush3.bf16.msra.mxu1 %v1926_v46  ;;  %v1609_v46 = vld [vmem:[%s2614_s4] ss:$0 sm:$0xff] }
  0x9e   : > { %1738 = vmatprep.subr.bf16.mxu1 %v2155_v0  ;;  %898 = vmatprep.subr.bf16.mxu0 %v1929_v47 }
  0xa1   : > { %899 = vmatpush1.bf16.msra.mxu0 %v1927_v48  ;;  %1739 = vmatpush3.bf16.msra.mxu1 %v1930_v49  ;;  %v295_v48 = vadd.s32 40, %v2380_v58 }
  0xa2   : > { %1740 = vmatprep.subr.bf16.mxu1 %v2155_v0  ;;  %900 = vmatprep.subr.bf16.mxu0 %v1933_v50 }
  0xa3   : > { %v301_v63 = vand.u32 15, %v295_v48  ;;  %v1943_v48 = vld [vmem:[#allocation8 + $0x78] ss:$12 sps:$4 sm:$0xff]  }
  0xa5   : > { %901 = vmatpush1.bf16.msra.mxu0 %v1931_v51  ;;  %1741 = vmatpush3.bf16.msra.mxu1 %v1934_v52  ;;  %v300_v51 = vand.u32 15, %v294_v35  ;;  %vm2452_vm9 = vcmp.eq.s32.totalorder %v301_v63, 15  ;;  %v1962_v63 = vld [vmem:[#allocation8 + $0x20] ss:$12 sps:$4 sm:$0xff]  }
  0xa6   : > { %1754 = vmatprep.subr.bf16.mxu1 %v2155_v0 }
  0xa7   : > { %vm2442_vm7 = vcmp.eq.s32.totalorder %v300_v51, 0  ;;  %v1947_v51 = vld [vmem:[#allocation8 + $0x60] ss:$12 sps:$4 sm:$0xff]  }
 0x147   : > { %v2374_v53 = vpop.f32.mrf.mxu1  ;;  %v2376_v55 = vpop.f32.mrf.mxu0 }
 0x148   : > { %v621_v15 = vrot.slane %v2376_v55, 7  ;;  %v634_v45 = vrot.slane %v2374_v53, 1 }
 0x149   : > { %v1716_v56 = vpop.f32.mrf.mxu1  ;;  %v2378_v57 = vpop.f32.mrf.mxu0 }
 0x14b   : > { %v2382_v59 = vpop.f32.mrf.mxu1  ;;  %v539_v60 = vpop.f32.mrf.mxu0 }
 0x14c   : > { %v635_v6 = vrot.slane %v2382_v59, 1  ;;  %v622_v11 = vrot.slane %v539_v60, 7 }
 0x14d   : > { %v1717_v61 = vpop.f32.mrf.mxu1  ;;  %v541_v62 = vpop.f32.mrf.mxu0 }
 0x14e   : > { %v632_v22 = vsel %vm627_vm2, %v621_v15, %v622_v11  ;;  %v645_v60 = vsel %vm640_vm1, %v634_v45, %v635_v6 }
 0x14f   : > { %v606_v2 = vpop.f32.mrf.mxu1  ;;  %v545_v3 = vpop.f32.mrf.mxu0  ;;  %v666_v32 = vadd.f32 %v632_v22, %v541_v62 }
 0x150   : > { %v636_v8 = vrot.slane %v606_v2, 1  ;;  %v623_v19 = vrot.slane %v545_v3, 7 }
 0x151   : > { %v1720_v4 = vpop.f32.mrf.mxu1  ;;  %v547_v5 = vpop.f32.mrf.mxu0 }
 0x152   : > { %v644_v18 = vsel %vm640_vm1, %v635_v6, %v636_v8  ;;  %v631_v34 = vsel %vm627_vm2, %v622_v11, %v623_v19 }
 0x153   : > { %v609_v10 = vpop.f32.mrf.mxu1  ;;  %v549_v12 = vpop.f32.mrf.mxu0  ;;  %v684_v29 = vsel %vm2391_vm3, 0.0, %v644_v18  ;;  %v661_v47 = vsel %vm2405_vm4, 0.0, %v631_v34 }
 0x154   : > { %v624_v26 = vrot.slane %v549_v12, 7  ;;  %v637_v30 = vrot.slane %v609_v10, 1  ;;  %v690_v40 = vadd.f32 %v684_v29, %v666_v32  ;;  %v667_v56 = vadd.f32 %v661_v47, %v547_v5  ;;  %v1945_v47 = vld [vmem:[#allocation8 + $0x7c] ss:$12 sps:$4 sm:$0xff]  }
 0x155   : > { %v1721_v14 = vpop.f32.mrf.mxu1  ;;  %v551_v16 = vpop.f32.mrf.mxu0 }
 0x156   : > { %v630_v41 = vsel %vm627_vm2, %v623_v19, %v624_v26  ;;  %v700_v55 = vadd.f32 %v1609_v46, %v690_v40  ;;  %v643_v61 = vsel %vm640_vm1, %v636_v8, %v637_v30  ;;  %v1937_v40 = vld [vmem:[#allocation8 + $0xac] ss:$12 sps:$4 sm:$0xff]  }
 0x157   : > { %v2397_v21 = vpop.f32.mrf.mxu1  ;;  %v555_v25 = vpop.f32.mrf.mxu0  ;;  %v668_v54 = vadd.f32 %v630_v41, %v551_v16  ;;  %v691_v6 = vadd.f32 %v667_v56, %v643_v61  ;;  %v1935_v41 = vld [vmem:[#allocation8 + $0xa8] ss:$12 sps:$4 sm:$0xff]   ;;  %1245 = vmatprep.subr.bf16.mxu0 %v1937_v40 }
 0x158   : > { %v638_v24 = vrot.slane %v2397_v21, 1  ;;  %v625_v50 = vrot.slane %v555_v25, 7  ;;  %v712_v9 = vmul.f32 0.2, %v700_v55  ;;  %vm706_vm8 = vcmp.gt.f32.partialorder %v700_v55, 0.0 }
 0x159   : > { %v1724_v27 = vpop.f32.mrf.mxu1  ;;  %v557_v31 = vpop.f32.mrf.mxu0  ;;  %v701_v16 = vadd.f32 %v1609_v46, %v691_v6  ;;  %v1957_v56 = vld [vmem:[#allocation8 + $0x34] ss:$12 sps:$4 sm:$0xff]   ;;  %v1961_v61 = vld [vmem:[#allocation8 + $0x1c] ss:$12 sps:$4 sm:$0xff]  }
 0x15a   : > { %v642_v38 = vsel %vm640_vm1, %v637_v30, %v638_v24  ;;  %v629_v3 = vsel %vm627_vm2, %v624_v26, %v625_v50  ;;  %v718_v20 = vsel %vm706_vm8, %v700_v55, %v712_v9  ;;  %v1954_v55 = vld [vmem:[#allocation8 + $0x50] ss:$12 sps:$4 sm:$0xff]  }
 0x15b   : > { %v617_v36 = vpop.f32.mrf.mxu1  ;;  %v559_v39 = vpop.f32.mrf.mxu0  ;;  %v686_v49 = vsel %vm2412_vm5, 0.0, %v642_v38  ;;  %v663_v11 = vsel %vm2442_vm7, 0.0, %v629_v3  ;;  %v713_v28 = vmul.f32 0.2, %v701_v16  ;;  %vm707_vm12 = vcmp.gt.f32.partialorder %v701_v16, 0.0 }
 0x15c   : > { %v626_v43 = vrot.slane %v559_v39, 7  ;;  %v692_v62 = vadd.f32 %v686_v49, %v668_v54  ;;  %v639_v4 = vrot.slane %v617_v36, 1  ;;  %v669_v18 = vadd.f32 %v663_v11, %v557_v31  ;;  %v1946_v49 = vld [vmem:[#allocation8 + $0x80] ss:$12 sps:$4 sm:$0xff]  }
 0x15d   : > { %v1725_v44 = vpop.f32.mrf.mxu1  ;;  %v561_v5 = vpop.f32.mrf.mxu0  ;;  %v719_v31 = vsel %vm707_vm12, %v701_v16, %v713_v28  ;;  %v1953_v54 = vld [vmem:[#allocation8 + $0x4c] ss:$12 sps:$4 sm:$0xff]  }
 0x15e   : > { %v633_v52 = vsel %vm627_vm2, %v626_v43, %v621_v15  ;;  %v702_v8 = vadd.f32 %v1609_v46, %v692_v62  ;;  %v646_v14 = vsel %vm640_vm1, %v639_v4, %v634_v45  ;;  %v641_v21 = vsel %vm640_vm1, %v638_v24, %v639_v4  ;;  %v1941_v44 = vld [vmem:[#allocation8 + $0x94] ss:$12 sps:$4 sm:$0xff]   ;;  %v1939_v45 = vld [vmem:[#allocation8 + $0x90] ss:$12 sps:$4 sm:$0xff]   ;;  %v1959_v62 = vld [vmem:[#allocation8 + $0x18] ss:$12 sps:$4 sm:$0xff]  }
 0x15f   : > { %v659_v53 = vsel %vm2420_vm6, 0.0, %v633_v52  ;;  %v688_v22 = vsel %vm2452_vm9, 0.0, %v646_v14  ;;  %v693_v27 = vadd.f32 %v669_v18, %v641_v21  ;;  %v1950_v52 = vld [vmem:[#allocation8 + $0x68] ss:$12 sps:$4 sm:$0xff]   ;;  %v1963_v3 = vld [vmem:[#allocation8] ss:$12 sps:$4 sm:$0xff]  }
 0x160   : > { %v665_v59 = vadd.f32 %v659_v53, %v2378_v57  ;;  %v628_v57 = vsel %vm627_vm2, %v625_v50, %v626_v43  ;;  %v714_v26 = vmul.f32 0.2, %v702_v8  ;;  %vm708_vm11 = vcmp.gt.f32.partialorder %v702_v8, 0.0  ;;  %v1938_v43 = vld [vmem:[#allocation8 + $0xb0] ss:$12 sps:$4 sm:$0xff]  }
 0x161   : > { %v670_v15 = vadd.f32 %v628_v57, %v561_v5  ;;  %v703_v24 = vadd.f32 %v1609_v46, %v693_v27  ;;  %v1949_v50 = vld [vmem:[#allocation8 + $0x64] ss:$12 sps:$4 sm:$0xff]   ;;  %v1951_v53 = vld [vmem:[#allocation8 + $0x48] ss:$12 sps:$4 sm:$0xff]  }
 0x162   : > { %v689_v7 = vadd.f32 %v665_v59, %v645_v60  ;;  %v720_v30 = vsel %vm708_vm11, %v702_v8, %v714_v26  ;;  %v1955_v59 = vld [vmem:[#allocation8 + $0x30] ss:$12 sps:$4 sm:$0xff]   ;;  %v1958_v60 = vld [vmem:[#allocation8 + $0x38] ss:$12 sps:$4 sm:$0xff]  }
 0x163   : > { %v694_v25 = vadd.f32 %v688_v22, %v670_v15  ;;  %v724_v32 = vpack.c.bf16 %v720_v30, %v719_v31  ;;  %v715_v35 = vmul.f32 0.2, %v703_v24  ;;  %vm709_vm14 = vcmp.gt.f32.partialorder %v703_v24, 0.0  ;;  %v1965_v4 = vld [vmem:[#allocation8 + $0x4] ss:$12 sps:$4 sm:$0xff]  }
 0x164   : > { %v699_v10 = vadd.f32 %v1609_v46, %v689_v7  ;;  %v1966_v7 = vld [vmem:[#allocation8 + $0x8] ss:$12 sps:$4 sm:$0xff]  }
 0x165   : > { %v704_v29 = vadd.f32 %v1609_v46, %v694_v25  ;;  %v721_v38 = vsel %vm709_vm14, %v703_v24, %v715_v35  ;;  %v1942_v46 = vld [vmem:[#allocation8 + $0x98] ss:$12 sps:$4 sm:$0xff]  }
 0x166   : > { %v711_v13 = vmul.f32 0.2, %v699_v10  ;;  %vm705_vm10 = vcmp.gt.f32.partialorder %v699_v10, 0.0 }
 0x167   : > { %v716_v34 = vmul.f32 0.2, %v704_v29  ;;  %vm710_vm13 = vcmp.gt.f32.partialorder %v704_v29, 0.0 }
 0x168   : > { %v717_v19 = vsel %vm705_vm10, %v699_v10, %v711_v13 }
 0x169   : > { %v723_v23 = vpack.c.bf16 %v718_v20, %v717_v19  ;;  %v722_v36 = vsel %vm710_vm13, %v704_v29, %v716_v34 }
 0x16a   : > { %v725_v39 = vpack.c.bf16 %v722_v36, %v721_v38 }
 0x16b   : > { %919 = vmatmul.mubr.bf16.vlgmr.msra.gmra.mxu0 %v723_v23  ;;  %1743 = vmatmul.mubr.bf16.vlgmr.msra.gmra.mxu1 %v723_v23 }
 0x16c   : > { %928 = vmatprep.mubr.bf16.mxu0 %v2157_v1  ;;  %1746 = vmatprep.mubr.msk.bf16.mxu1 %vm2156_vm0, %v2155_v0 }
 0x16d   : > { %1246 = vmatpush1.bf16.msra.mxu0 %v1935_v41  ;;  %1755 = vmatpush3.bf16.msra.mxu1 %v1938_v43 }
 0x16e   : > { %1756 = vmatprep.subr.bf16.mxu1 %v2155_v0  ;;  %1247 = vmatprep.subr.bf16.mxu0 %v1941_v44 }
 0x171   : > { %1248 = vmatpush1.bf16.msra.mxu0 %v1939_v45  ;;  %1757 = vmatpush3.bf16.msra.mxu1 %v1942_v46 }
 0x172   : > { %1758 = vmatprep.subr.bf16.mxu1 %v2155_v0  ;;  %1249 = vmatprep.subr.bf16.mxu0 %v1945_v47 }
 0x173   : > { %929 = vmatmul.mubr.bf16.gmra.mxu0 %v724_v32  ;;  %1747 = vmatmul.mubr.bf16.gmra.mxu1 %v724_v32 }
 0x174   : > { %938 = vmatprep.mubr.bf16.mxu0 %v2157_v1  ;;  %1750 = vmatprep.mubr.msk.bf16.mxu1 %vm2156_vm0, %v2155_v0 }
 0x175   : > { %1250 = vmatpush1.bf16.msra.mxu0 %v1943_v48  ;;  %1759 = vmatpush3.bf16.msra.mxu1 %v1946_v49  ;;  %v1634_v49 = vld [vmem:[%s2614_s4 + $0x1] ss:$0 sm:$0xff] }
 0x176   : > { %1760 = vmatprep.subr.bf16.mxu1 %v2155_v0  ;;  %1251 = vmatprep.subr.bf16.mxu0 %v1949_v50 }
 0x179   : > { %1252 = vmatpush1.bf16.msra.mxu0 %v1947_v51  ;;  %1761 = vmatpush3.bf16.msra.mxu1 %v1950_v52 }
 0x17a   : > { %1762 = vmatprep.subr.bf16.mxu1 %v2155_v0  ;;  %1253 = vmatprep.subr.bf16.mxu0 %v1953_v54 }
 0x17b   : > { %939 = vmatmul.mubr.bf16.gmra.mxu0 %v725_v39  ;;  %1751 = vmatmul.mubr.bf16.gmra.mxu1 %v725_v39 }
 0x17c   : > { %1277 = vmatprep.mubr.bf16.mxu0 %v2157_v1  ;;  %1770 = vmatprep.mubr.msk.bf16.mxu1 %vm2156_vm0, %v2155_v0 }
 0x17d   : > { %1254 = vmatpush1.bf16.msra.mxu0 %v1951_v53  ;;  %1763 = vmatpush3.bf16.msra.mxu1 %v1954_v55 }
 0x17e   : > { %1764 = vmatprep.subr.bf16.mxu1 %v2155_v0  ;;  %1255 = vmatprep.subr.bf16.mxu0 %v1957_v56 }
 0x181   : > { %1256 = vmatpush1.bf16.msra.mxu0 %v1955_v59  ;;  %1765 = vmatpush3.bf16.msra.mxu1 %v1958_v60 }
 0x182   : > { %1766 = vmatprep.subr.bf16.mxu1 %v2155_v0  ;;  %1257 = vmatprep.subr.bf16.mxu0 %v1961_v61 }
 0x185   : > { %1258 = vmatpush1.bf16.msra.mxu0 %v1959_v62  ;;  %1767 = vmatpush3.bf16.msra.mxu1 %v1962_v63 }
 0x186   : > { %1768 = vmatprep.subr.bf16.mxu1 %v2155_v0  ;;  %1259 = vmatprep.subr.bf16.mxu0 %v1965_v4 }
 0x189   : > { %1260 = vmatpush1.bf16.msra.mxu0 %v1963_v3  ;;  %1769 = vmatpush3.bf16.msra.mxu1 %v1966_v7 }
 0x22b   : > { %v920_v5 = vpop.f32.mrf.mxu0  ;;  %v2478_v57 = vpop.f32.mrf.mxu1 }
 0x22c   : > { %v1006_v25 = vrot.slane %v920_v5, 7  ;;  %v1018_v53 = vrot.slane %v2478_v57, 1 }
 0x22d   : > { %v922_v9 = vpop.f32.mrf.mxu0  ;;  %v1744_v6 = vpop.f32.mrf.mxu1 }
 0x22f   : > { %v924_v10 = vpop.f32.mrf.mxu0  ;;  %v986_v8 = vpop.f32.mrf.mxu1 }
 0x230   : > { %v1007_v20 = vrot.slane %v924_v10, 7  ;;  %v1019_v23 = vrot.slane %v986_v8, 1 }
 0x231   : > { %v926_v11 = vpop.f32.mrf.mxu0  ;;  %v1745_v13 = vpop.f32.mrf.mxu1 }
 0x232   : > { %v1016_v30 = vsel %vm627_vm2, %v1006_v25, %v1007_v20  ;;  %v1028_v3 = vsel %vm640_vm1, %v1018_v53, %v1019_v23 }
 0x233   : > { %v930_v14 = vpop.f32.mrf.mxu0  ;;  %v991_v15 = vpop.f32.mrf.mxu1  ;;  %v1037_v40 = vadd.f32 %v1016_v30, %v926_v11 }
 0x234   : > { %v1020_v19 = vrot.slane %v991_v15, 1  ;;  %v1008_v26 = vrot.slane %v930_v14, 7 }
 0x235   : > { %v932_v16 = vpop.f32.mrf.mxu0  ;;  %v1748_v18 = vpop.f32.mrf.mxu1 }
 0x236   : > { %v1027_v29 = vsel %vm640_vm1, %v1019_v23, %v1020_v19  ;;  %v1015_v35 = vsel %vm627_vm2, %v1007_v20, %v1008_v26 }
 0x237   : > { %v934_v21 = vpop.f32.mrf.mxu0  ;;  %v994_v22 = vpop.f32.mrf.mxu1  ;;  %v1043_v34 = vsel %vm2391_vm3, 0.0, %v1027_v29  ;;  %v1032_v46 = vsel %vm2405_vm4, 0.0, %v1015_v35 }
 0x238   : > { %v1009_v36 = vrot.slane %v934_v21, 7  ;;  %v1021_v41 = vrot.slane %v994_v22, 1  ;;  %v1049_v45 = vadd.f32 %v1043_v34, %v1037_v40  ;;  %v1038_v55 = vadd.f32 %v1032_v46, %v932_v16 }
 0x239   : > { %v936_v27 = vpop.f32.mrf.mxu0  ;;  %v1749_v28 = vpop.f32.mrf.mxu1 }
 0x23a   : > { %v1014_v50 = vsel %vm627_vm2, %v1008_v26, %v1009_v36  ;;  %v1059_v60 = vadd.f32 %v1634_v49, %v1049_v45  ;;  %v1026_v4 = vsel %vm640_vm1, %v1020_v19, %v1021_v41 }
 0x23b   : > { %v940_v24 = vpop.f32.mrf.mxu0  ;;  %v999_v31 = vpop.f32.mrf.mxu1  ;;  %v1039_v61 = vadd.f32 %v1014_v50, %v936_v27  ;;  %v1050_v11 = vadd.f32 %v1038_v55, %v1026_v4 }
 0x23c   : > { %v1022_v32 = vrot.slane %v999_v31, 1  ;;  %v1010_v52 = vrot.slane %v940_v24, 7  ;;  %v1071_v8 = vmul.f32 0.2, %v1059_v60  ;;  %vm1065_vm15 = vcmp.gt.f32.partialorder %v1059_v60, 0.0 }
 0x23d   : > { %v942_v38 = vpop.f32.mrf.mxu0  ;;  %v1752_v39 = vpop.f32.mrf.mxu1  ;;  %v1060_v20 = vadd.f32 %v1634_v49, %v1050_v11 }
 0x23e   : > { %v1025_v47 = vsel %vm640_vm1, %v1021_v41, %v1022_v32  ;;  %v1013_v5 = vsel %vm627_vm2, %v1009_v36, %v1010_v52  ;;  %v1077_v23 = vsel %vm1065_vm15, %v1059_v60, %v1071_v8 }
 0x23f   : > { %v944_v43 = vpop.f32.mrf.mxu0  ;;  %v1002_v44 = vpop.f32.mrf.mxu1  ;;  %v1045_v56 = vsel %vm2412_vm5, 0.0, %v1025_v47  ;;  %v1034_v14 = vsel %vm2442_vm7, 0.0, %v1013_v5  ;;  %v1072_v30 = vmul.f32 0.2, %v1060_v20  ;;  %vm1066_vm11 = vcmp.gt.f32.partialorder %v1060_v20, 0.0 }
 0x240   : > { %v1011_v48 = vrot.slane %v944_v43, 7  ;;  %v1023_v63 = vrot.slane %v1002_v44, 1  ;;  %v1051_v7 = vadd.f32 %v1045_v56, %v1039_v61  ;;  %v1040_v21 = vadd.f32 %v1034_v14, %v942_v38 }
 0x241   : > { %v1753_v51 = vpop.f32.mrf.mxu1  ;;  %v946_v6 = vpop.f32.mrf.mxu0  ;;  %v1078_v35 = vsel %vm1066_vm11, %v1060_v20, %v1072_v30 }
 0x242   : > { %v1017_v54 = vsel %vm627_vm2, %v1011_v48, %v1006_v25  ;;  %v1012_v10 = vsel %vm627_vm2, %v1010_v52, %v1011_v48  ;;  %v1061_v15 = vadd.f32 %v1634_v49, %v1051_v7  ;;  %v1024_v25 = vsel %vm640_vm1, %v1022_v32, %v1023_v63 }
 0x243   : > { %v1030_v59 = vsel %vm2420_vm6, 0.0, %v1017_v54  ;;  %v1041_v18 = vadd.f32 %v1012_v10, %v946_v6  ;;  %v1052_v29 = vadd.f32 %v1040_v21, %v1024_v25 }
 0x244   : > { %v1036_v62 = vadd.f32 %v1030_v59, %v922_v9  ;;  %v1029_v9 = vsel %vm640_vm1, %v1023_v63, %v1018_v53  ;;  %v1073_v28 = vmul.f32 0.2, %v1061_v15  ;;  %vm1067_vm10 = vcmp.gt.f32.partialorder %v1061_v15, 0.0 }
 0x245   : > { %v1047_v19 = vsel %vm2452_vm9, 0.0, %v1029_v9  ;;  %v1062_v34 = vadd.f32 %v1634_v49, %v1052_v29 }
 0x246   : > { %v1048_v57 = vadd.f32 %v1036_v62, %v1028_v3  ;;  %v1053_v27 = vadd.f32 %v1047_v19, %v1041_v18  ;;  %v1079_v31 = vsel %vm1067_vm10, %v1061_v15, %v1073_v28 }
 0x247   : > { %v1083_v36 = vpack.c.bf16 %v1079_v31, %v1078_v35  ;;  %v1074_v38 = vmul.f32 0.2, %v1062_v34  ;;  %vm1068_vm13 = vcmp.gt.f32.partialorder %v1062_v34, 0.0 }
 0x248   : > { %v1058_v13 = vadd.f32 %v1634_v49, %v1048_v57  ;;  %v1063_v24 = vadd.f32 %v1634_v49, %v1053_v27 }
 0x249   : > { %v1080_v40 = vsel %vm1068_vm13, %v1062_v34, %v1074_v38 }
 0x24a   : > { %v1070_v16 = vmul.f32 0.2, %v1058_v13  ;;  %vm1064_vm8 = vcmp.gt.f32.partialorder %v1058_v13, 0.0  ;;  %v1075_v32 = vmul.f32 0.2, %v1063_v24  ;;  %vm1069_vm12 = vcmp.gt.f32.partialorder %v1063_v24, 0.0 }
 0x24c   : > { %v1076_v22 = vsel %vm1064_vm8, %v1058_v13, %v1070_v16  ;;  %v1081_v39 = vsel %vm1069_vm12, %v1063_v24, %v1075_v32 }
 0x24d   : > { %v1082_v26 = vpack.c.bf16 %v1077_v23, %v1076_v22  ;;  %v1084_v41 = vpack.c.bf16 %v1081_v39, %v1080_v40 }
 0x24f   : > { %1278 = vmatmul.mubr.bf16.vlgmr.msra.gmra.mxu0 %v1082_v26  ;;  %1771 = vmatmul.mubr.bf16.vlgmr.msra.gmra.mxu1 %v1082_v26 }
 0x250   : > { %1287 = vmatprep.mubr.bf16.mxu0 %v2157_v1  ;;  %1774 = vmatprep.mubr.msk.bf16.mxu1 %vm2156_vm0, %v2155_v0 }
 0x257   : > { %1288 = vmatmul.mubr.bf16.gmra.mxu0 %v1083_v36  ;;  %1775 = vmatmul.mubr.bf16.gmra.mxu1 %v1083_v36 }
 0x258   : > { %1297 = vmatprep.mubr.bf16.mxu0 %v2157_v1  ;;  %1778 = vmatprep.mubr.msk.bf16.mxu1 %vm2156_vm0, %v2155_v0  ;;  %vm1455_vm0 = vcmask 392192  }
 0x25f   : > { %1298 = vmatmul.mubr.bf16.gmra.mxu0 %v1084_v41  ;;  %1779 = vmatmul.mubr.bf16.gmra.mxu1 %v1084_v41 }
 0x30f   : > { %v1279_v43 = vpop.f32.mrf.mxu0  ;;  %v2526_v44 = vpop.f32.mrf.mxu1 }
 0x310   : > { %v1365_v57 = vrot.slane %v1279_v43, 7  ;;  %v1377_v14 = vrot.slane %v2526_v44, 1 }
 0x311   : > { %v1281_v45 = vpop.f32.mrf.mxu0  ;;  %v1772_v46 = vpop.f32.mrf.mxu1 }
 0x313   : > { %v1283_v47 = vpop.f32.mrf.mxu0  ;;  %v1345_v48 = vpop.f32.mrf.mxu1 }
 0x314   : > { %v1366_v4 = vrot.slane %v1283_v47, 7  ;;  %v1378_v6 = vrot.slane %v1345_v48, 1 }
 0x315   : > { %v1285_v49 = vpop.f32.mrf.mxu0  ;;  %v1773_v50 = vpop.f32.mrf.mxu1 }
 0x316   : > { %v1375_v15 = vsel %vm627_vm2, %v1365_v57, %v1366_v4  ;;  %v1387_v21 = vsel %vm640_vm1, %v1377_v14, %v1378_v6 }
 0x317   : > { %v1289_v1 = vpop.f32.mrf.mxu0  ;;  %v1350_v51 = vpop.f32.mrf.mxu1  ;;  %v1396_v23 = vadd.f32 %v1375_v15, %v1285_v49 }
 0x318   : > { %v1367_v63 = vrot.slane %v1289_v1, 7  ;;  %v1379_v3 = vrot.slane %v1350_v51, 1 }
 0x319   : > { %v1291_v52 = vpop.f32.mrf.mxu0  ;;  %v1776_v0 = vpop.f32.mrf.mxu1 }
 0x31a   : > { %v1386_v11 = vsel %vm640_vm1, %v1378_v6, %v1379_v3  ;;  %v1374_v13 = vsel %vm627_vm2, %v1366_v4, %v1367_v63 }
 0x31b   : > { %v1293_v54 = vpop.f32.mrf.mxu0  ;;  %v1353_v53 = vpop.f32.mrf.mxu1  ;;  %v1391_v19 = vsel %vm2405_vm4, 0.0, %v1374_v13  ;;  %v1402_v22 = vsel %vm2391_vm3, 0.0, %v1386_v11 }
 0x31c   : > { %v1380_v20 = vrot.slane %v1353_v53, 1  ;;  %v1368_v28 = vrot.slane %v1293_v54, 7  ;;  %v1397_v29 = vadd.f32 %v1391_v19, %v1291_v52  ;;  %v1408_v33 = vadd.f32 %v1402_v22, %v1396_v23 }
 0x31d   : > { %v1295_v55 = vpop.f32.mrf.mxu0  ;;  %v1777_v56 = vpop.f32.mrf.mxu1 }
 0x31e   : > { %v1385_v24 = vsel %vm640_vm1, %v1379_v3, %v1380_v20  ;;  %v1373_v34 = vsel %vm627_vm2, %v1367_v63, %v1368_v28  ;;  %v1418_v35 = vadd.f32 %v1659_v42, %v1408_v33 }
 0x31f   : > { %v1299_v59 = vpop.f32.mrf.mxu0  ;;  %v1358_v60 = vpop.f32.mrf.mxu1  ;;  %v1409_v36 = vadd.f32 %v1397_v29, %v1385_v24  ;;  %v1398_v40 = vadd.f32 %v1373_v34, %v1295_v55 }
 0x320   : > { %v1369_v25 = vrot.slane %v1299_v59, 7  ;;  %v1381_v26 = vrot.slane %v1358_v60, 1 }
 0x321   : > { %v1301_v61 = vpop.f32.mrf.mxu0  ;;  %v1780_v62 = vpop.f32.mrf.mxu1  ;;  %v1419_v43 = vadd.f32 %v1659_v42, %v1409_v36 }
 0x322   : > { %v1384_v31 = vsel %vm640_vm1, %v1380_v20, %v1381_v26  ;;  %v1372_v17 = vsel %vm627_vm2, %v1368_v28, %v1369_v25 }
 0x323   : > { %v1303_v7 = vpop.f32.mrf.mxu0  ;;  %v1361_v5 = vpop.f32.mrf.mxu1  ;;  %v1393_v32 = vsel %vm2442_vm7, 0.0, %v1372_v17  ;;  %v1404_v39 = vsel %vm2412_vm5, 0.0, %v1384_v31 }
 0x324   : > { %v1370_v10 = vrot.slane %v1303_v7, 7  ;;  %v1382_v38 = vrot.slane %v1361_v5, 1  ;;  %v1399_v41 = vadd.f32 %v1393_v32, %v1301_v61  ;;  %v1410_v44 = vadd.f32 %v1404_v39, %v1398_v40 }
 0x325   : > { %v1781_v8 = vpop.f32.mrf.mxu1 }
 0x326   : > { %v1376_v9 = vsel %vm627_vm2, %v1370_v10, %v1365_v57  ;;  %v1371_v46 = vsel %vm627_vm2, %v1369_v25, %v1370_v10  ;;  %v1383_v47 = vsel %vm640_vm1, %v1381_v26, %v1382_v38  ;;  %v1388_v2 = vsel %vm640_vm1, %v1382_v38, %v1377_v14 }
 0x327   : > { %v1389_v16 = vsel %vm2420_vm6, 0.0, %v1376_v9  ;;  %v1420_v48 = vadd.f32 %v1659_v42, %v1410_v44  ;;  %v1411_v49 = vadd.f32 %v1399_v41, %v1383_v47  ;;  %v1406_v50 = vsel %vm2452_vm9, 0.0, %v1388_v2 }
 0x328   : > { %v1395_v18 = vadd.f32 %v1389_v16, %v1281_v45  ;;  %v1305_v45 = vpop.f32.mrf.mxu0 }
 0x329   : > { %v1400_v37 = vadd.f32 %v1371_v46, %v1305_v45  ;;  %v1421_v51 = vadd.f32 %v1659_v42, %v1411_v49 }
 0x32a   : > { %v1407_v27 = vadd.f32 %v1395_v18, %v1387_v21 }
 0x32b   : > { %v1412_v1 = vadd.f32 %v1406_v50, %v1400_v37 }
 0x32c   : > { %v1417_v30 = vadd.f32 %v1659_v42, %v1407_v27 }
 0x32d   : > { %v1422_v52 = vadd.f32 %v1659_v42, %v1412_v1 }
 0x32e   : > { %1423 = vxpose.xlu0.b32.start [1/6] (short) (narrow) %v1417_v30, 8 }
 0x332   : > { %1424 = vxpose.xlu0.b32.cont [2/6] (short) (narrow) %v1418_v35, 8 }
 0x336   : > { %1425 = vxpose.xlu0.b32.cont [3/6] (short) (narrow) %v1419_v43, 8 }
 0x33a   : > { %1426 = vxpose.xlu0.b32.cont [4/6] (short) (narrow) %v1420_v48, 8 }
 0x33e   : > { %1427 = vxpose.xlu0.b32.cont [5/6] (short) (narrow) %v1421_v51, 8 }
 0x342   : > { %1428 = vxpose.xlu0.b32.end [6/6] (short) (narrow) %v1422_v52, 8 }
 0x3aa   : > { %v1439_v58 = vpop.trf.xlu0 }
 0x3ab   : > { %1456 = vst.msk [vmem:[%s286_s11] sm:$0xff] %vm1455_vm0, %v1439_v58 }
 0x3ac   : > { %2086 = shalt.err (!%p2083_p9)
}
 0x3ad   : > { %s2087_s13 = scalar_lea.hbm %s2573_s29, 128  ;;  %s2091_s16 = scalar_lea.hbm %s2615_s5, 256 }
 0x3ae   : > { %p2088_p1 = scmp.ne.s32.totalorder %s2573_s29, %s2087_s13  ;;  %p2092_p11 = scmp.lt.s32.totalorder %s2573_s29, %s2615_s5 }
 0x3af   : > { %p2093_p13 = scmp.lt.s32.totalorder %s2091_s16, %s2087_s13 }
 0x3b0   : > { %p2089_p8 = pnand %p2088_p1, %p2645_p6 }
 0x3b1   : > { %p2094_p2 = por %p2093_p13, %p2092_p11 }
 0x3b2   : > { %p2090_p10 = pneg %p2089_p8 }
 0x3b4   : > { %p2095_p4 = pnand %p2094_p2, %p2090_p10 }
 0x3b6   : > { %2098 = shalt.err (!%p2095_p4)
}
 0x3b7   : > { %1798 = dma.vmem_to_hbm [thread:$0]  (%p2645_p6), %s1472_s15, 128, %s2573_s29, %s1458_s12  }
 0x3b8 PF: > { %s1483_s8 = sand.u32 1, %s2133_s18   ;;  %p2646_p12 = scmp.ne.s32.totalorder %s2621_s25, 0 }
 0x3b9   : > { %p2647_p0 = scmp.ge.s32.totalorder %s2145_s21, 2  ;;  %s1484_s11 = scalar_lea.sflag [#allocation4], %s1483_s8 }
 0x3bb   : > { %p1815_p5 = pnand %p2647_p0, %p2646_p12 }
 0x3bd   : > { %p1816_p3 = pneg %p1815_p5 }
 0x3bf   : > { %2128 = dma.done.wait (%p1816_p3), %s1484_s11, 128  }
 0x3c0   : > { %2130 = vsyncadd (%p1816_p3), %s1484_s11, 4294967168  ;;  %p20_p7 = scmp.ge.s32.totalorder %s2269_s28, 4   ;;  %s2648_s18 = smov %s2137_s19 }
 0x3c1   : > { %s2649_s19 = smov %s2141_s20  ;;  %s2650_s20 = smov %s2279_s6 }
 0x3c2   : > { %s2651_s21 = smov %s2269_s28  ;;  %22 = sbr.rel (!%p20_p7) target bundleno = 7 (0x7), region = 97 }
 0x3c7   :  { %1489 = vsyncpa [#allocation3], 1 }
 0x3c8   :  { %1491 = vsyncpa [#allocation3 + $0x1], 1 }
 0x3c9   :  { %1492 = vsyncpa [#allocation6], 1 }
 0x3ca   :  { %1493 = vsyncpa [#allocation9], 1 }
 0x3cb   :  { %1494 = vsyncpa [#allocation4], 1 }
 0x3cc   :  { %1496 = vsyncpa [#allocation4 + $0x1], 1 }

</bundles_post_ra>
